<compile_context>
chip_gen: v7x
topology: tpu7x:2x2x1
jax: 0.10.0
libtpu: 0.0.40
codegen_flags: <defaults>
</compile_context>

<pallas_src>
import jax
import jax.numpy as jnp
from jax.experimental import pallas as pl
from jax.experimental.pallas import tpu as pltpu

# Problem sizes (consistent with an NCHW conv-net input).
B, C, H, W = 2, 4, 16, 16
D = C * H * W              # 1024 (already a multiple of 128)
HID = 32
K = 10                     # num classes

# TPU-friendly padded sizes.
B_PAD = 8                  # f32 sublane tile
HID_PAD = 128              # lane tile
K_PAD = 128                # lane tile
NEG_INF = -1e30


# ----------------------------- Pallas kernel ------------------------------ #

def _fused_mlp_mixup_ce_kernel(lam_ref, lab_ref,
                               x_ref, w1_ref, b1_ref, w2_ref, b2_ref,
                               logits_ref, stats_ref):
    """Fused model forward + mixup cross-entropy loss.

    lam_ref    : SMEM (1,)            f32  mixup coefficient
    lab_ref    : SMEM (B, 2)          i32  col 0 = batch labels, col 1 = t_b
    x_ref      : VMEM (B_PAD, D)      bf16 (rows >= B are zero padding)
    w1_ref     : VMEM (D, HID_PAD)    bf16
    b1_ref     : VMEM (1, HID_PAD)    f32
    w2_ref     : VMEM (HID_PAD, K_PAD) bf16
    b2_ref     : VMEM (1, K_PAD)      f32
    logits_ref : VMEM (B_PAD, K_PAD)  f32  lane-dense padded logits
    stats_ref  : VMEM (1, 128)        f32  lane 0: loss, 1: ce_labels, 2: ce_mix
    """
    # Hoist scalar reads / constants off the critical path.
    lam = lam_ref[0]
    one_minus_lam = 1.0 - lam
    inv_b = 1.0 / float(B)                           # compile-time constant

    # ---- Model: logits = relu(x @ w1 + b1) @ w2 + b2 (bf16 MXU, f32 acc) ----
    h = jnp.dot(x_ref[...], w1_ref[...], preferred_element_type=jnp.float32)
    h = jnp.maximum(h + b1_ref[...], 0.0)            # f32 VPU math
    logits = jnp.dot(h.astype(jnp.bfloat16), w2_ref[...],
                     preferred_element_type=jnp.float32) + b2_ref[...]
    logits_ref[...] = logits                         # full-width (8,128) store

    # ---- Mixup cross-entropy (stable logsumexp; mask padded lanes/rows) ----
    cls = jax.lax.broadcasted_iota(jnp.int32, (B_PAD, K_PAD), 1)
    rows = jax.lax.broadcasted_iota(jnp.int32, (B_PAD, K_PAD), 0)
    # 1.0 for real batch rows, 0.0 for padded rows, shape (B_PAD, 1).
    row_valid = jnp.max(jnp.where(rows < B, 1.0, 0.0), axis=-1, keepdims=True)

    masked = jnp.where(cls < K, logits, NEG_INF)     # kill padded class lanes
    m = jnp.max(masked, axis=-1, keepdims=True)
    lse = m + jnp.log(jnp.sum(jnp.exp(masked - m), axis=-1, keepdims=True))

    # Per-row label matrices built from SMEM scalars (padded rows stay -1).
    y_mat = jnp.full((B_PAD, K_PAD), -1, jnp.int32)
    t_mat = jnp.full((B_PAD, K_PAD), -1, jnp.int32)
    for r in range(B):                               # tiny static unroll
        y_mat = jnp.where(rows == r, lab_ref[r, 0], y_mat)
        t_mat = jnp.where(rows == r, lab_ref[r, 1], t_mat)

    logit_y = jnp.sum(jnp.where(cls == y_mat, logits, 0.0), axis=-1, keepdims=True)
    logit_t = jnp.sum(jnp.where(cls == t_mat, logits, 0.0), axis=-1, keepdims=True)
    ce_y = (lse - logit_y) * row_valid               # (B_PAD, 1)
    ce_t = (lse - logit_t) * row_valid
    mix = lam * ce_y + one_minus_lam * ce_t

    loss_m = jnp.sum(mix, axis=0, keepdims=True) * inv_b    # (1, 1)
    ce_y_m = jnp.sum(ce_y, axis=0, keepdims=True) * inv_b
    ce_t_m = jnp.sum(ce_t, axis=0, keepdims=True) * inv_b

    # Pack the three stats into one lane-dense row (lanes 0..2 used).
    lane = jax.lax.broadcasted_iota(jnp.int32, (1, 128), 1)
    stats = jnp.where(lane == 0, loss_m, 0.0)
    stats = jnp.where(lane == 1, ce_y_m, stats)
    stats = jnp.where(lane == 2, ce_t_m, stats)
    stats_ref[...] = stats


# ------------------------------ JAX wrapper -------------------------------- #

def make_fused_model_with_loss(params):
    """Pads/casts parameters once; returns a jitted callable
    fused(batch, mix_label, lam) -> (outputs [B, K], loss, loss_stats)
    that runs the whole forward + loss in ONE pallas_call."""
    w1_p = jnp.pad(params["w1"], ((0, 0), (0, HID_PAD - HID))).astype(jnp.bfloat16)
    b1_p = jnp.pad(params["b1"], ((0, 0), (0, HID_PAD - HID))).astype(jnp.float32)
    w2_p = jnp.pad(params["w2"], ((0, HID_PAD - HID), (0, K_PAD - K))).astype(jnp.bfloat16)
    b2_p = jnp.pad(params["b2"], ((0, 0), (0, K_PAD - K))).astype(jnp.float32)

    call = pl.pallas_call(
        _fused_mlp_mixup_ce_kernel,
        out_shape=(jax.ShapeDtypeStruct((B_PAD, K_PAD), jnp.float32),
                   jax.ShapeDtypeStruct((1, 128), jnp.float32)),
        in_specs=[pl.BlockSpec(memory_space=pltpu.MemorySpace.SMEM),   # lam
                  pl.BlockSpec(memory_space=pltpu.MemorySpace.SMEM),   # labels (y, t_b)
                  pl.BlockSpec(memory_space=pltpu.MemorySpace.VMEM),   # x
                  pl.BlockSpec(memory_space=pltpu.MemorySpace.VMEM),   # w1
                  pl.BlockSpec(memory_space=pltpu.MemorySpace.VMEM),   # b1
                  pl.BlockSpec(memory_space=pltpu.MemorySpace.VMEM),   # w2
                  pl.BlockSpec(memory_space=pltpu.MemorySpace.VMEM)],  # b2
        out_specs=(pl.BlockSpec(memory_space=pltpu.MemorySpace.VMEM),
                   pl.BlockSpec(memory_space=pltpu.MemorySpace.VMEM)),
    )
    # For a real training batch one would add a grid over B (128-256 row blocks,
    # dimension_semantics=("parallel",) for v7x's two TensorCores); at B=2 a
    # single padded block is optimal.

    def fused(batch, mix_label, lam):
        x = batch["input"]
        x2d = x.reshape(x.shape[0], -1)              # NCHW flatten (row-major)
        x_pad = jnp.pad(x2d, ((0, B_PAD - B), (0, 0))).astype(jnp.bfloat16)
        lab = jnp.stack([batch["labels"].astype(jnp.int32),
                         mix_label["labels"].astype(jnp.int32)], axis=1)  # (B, 2)
        lam_arr = jnp.asarray(lam, jnp.float32).reshape(1)

        logits_pad, stats = call(lam_arr, lab, x_pad, w1_p, b1_p, w2_p, b2_p)
        outputs = logits_pad[:B, :K]
        loss = stats[0, 0]
        loss_stats = {"loss": loss, "ce_labels": stats[0, 1], "ce_mix": stats[0, 2]}
        return outputs, loss, loss_stats

    return jax.jit(fused)


class ModleWithLoss:
    """JAX/Pallas equivalent of the PyTorch wrapper (same forward semantics).

    model forward and loss are fused into a single Pallas kernel, so `model`
    here is the fused callable; `loss` is kept only for constructor parity
    with the original (model, loss) interface.
    """

    def __init__(self, model, loss=None):
        self.model = model
        self.loss = loss   # fused into the model's pallas_call

    def __call__(self, batch, t_b=None, lam=None):
        mix_label = {}
        mix_label["labels"] = t_b
        outputs, loss, loss_stats = self.model(batch, mix_label, lam)
        return (outputs, loss, loss_stats)


# ---------------------------------- main ----------------------------------- #

if __name__ == "__main__":
    key = jax.random.PRNGKey(0)
    k_x, k_w1, k_w2, k_y, k_t = jax.random.split(key, 5)

    # Deterministic parameter init (shapes implied by the synthetic model head).
    params = {
        "w1": jax.random.normal(k_w1, (D, HID), jnp.float32) * (1.0 / jnp.sqrt(D)),
        "b1": jnp.zeros((1, HID), jnp.float32),
        "w2": jax.random.normal(k_w2, (HID, K), jnp.float32) * (1.0 / jnp.sqrt(HID)),
        "b2": jnp.zeros((1, K), jnp.float32),
    }

    x = jax.random.normal(k_x, (B, C, H, W), jnp.float32)      # NCHW, like PyTorch
    labels = jax.random.randint(k_y, (B,), 0, K, jnp.int32)
    t_b = jax.random.randint(k_t, (B,), 0, K, jnp.int32)       # mixup partner labels
    lam = jnp.float32(0.7)

    batch = {"input": x, "labels": labels}

    module = ModleWithLoss(make_fused_model_with_loss(params), loss=None)
    outputs, loss, loss_stats = module(batch, t_b=t_b, lam=lam)
    jax.block_until_ready((outputs, loss, loss_stats))

    # Pure-JAX reference of the same forward (same bf16 matmul operands,
    # f32 accumulation, f32 element-wise math).
    x2d = x.reshape(B, -1)
    ref_h = jnp.dot(x2d.astype(jnp.bfloat16), params["w1"].astype(jnp.bfloat16),
                    preferred_element_type=jnp.float32)
    ref_h = jnp.maximum(ref_h + params["b1"], 0.0)
    ref_logits = jnp.dot(ref_h.astype(jnp.bfloat16), params["w2"].astype(jnp.bfloat16),
                         preferred_element_type=jnp.float32) + params["b2"]
    ref_lse = jax.nn.logsumexp(ref_logits, axis=-1)
    ref_ce_y = ref_lse - ref_logits[jnp.arange(B), labels]
    ref_ce_t = ref_lse - ref_logits[jnp.arange(B), t_b]
    ref_loss = jnp.mean(lam * ref_ce_y + (1.0 - lam) * ref_ce_t)

    assert outputs.shape == (B, K)
    assert jnp.allclose(outputs, ref_logits, atol=1e-3, rtol=1e-3)
    assert jnp.allclose(loss, ref_loss, atol=1e-3, rtol=1e-3)
    assert jnp.allclose(loss_stats["ce_labels"], jnp.mean(ref_ce_y), atol=1e-3, rtol=1e-3)
    assert jnp.allclose(loss_stats["ce_mix"], jnp.mean(ref_ce_t), atol=1e-3, rtol=1e-3)

    print("KERNEL_OK")
</pallas_src>

<mosaic_0001>
module attributes {stable_mosaic.version = 11 : i64} {
  func.func @_fused_mlp_mixup_ce_kernel(%arg0: memref<1xf32, #tpu.memory_space<smem>>, %arg1: memref<2x2xi32, #tpu.memory_space<smem>>, %arg2: memref<8x1024xbf16, #tpu.memory_space<vmem>>, %arg3: memref<1024x128xbf16, #tpu.memory_space<vmem>>, %arg4: memref<1x128xf32, #tpu.memory_space<vmem>>, %arg5: memref<128x128xbf16, #tpu.memory_space<vmem>>, %arg6: memref<1x128xf32, #tpu.memory_space<vmem>>, %arg7: memref<8x128xf32, #tpu.memory_space<vmem>>, %arg8: memref<1x128xf32, #tpu.memory_space<vmem>>) attributes {dimension_semantics = [], scalar_prefetch = 0 : i64, scratch_operands = 0 : i64, tpu.core_type = #tpu.core_type<tc>} {
    %c0 = arith.constant 0 : index
    %0 = memref.load %arg0[%c0] : memref<1xf32, #tpu.memory_space<smem>>
    %cst = arith.constant 1.000000e+00 : f32
    %1 = arith.subf %cst, %0 : f32
    %c0_0 = arith.constant 0 : index
    %c0_1 = arith.constant 0 : index
    %2 = vector.load %arg2[%c0_0, %c0_1] : memref<8x1024xbf16, #tpu.memory_space<vmem>>, vector<8x1024xbf16>
    %c0_2 = arith.constant 0 : index
    %c0_3 = arith.constant 0 : index
    %3 = vector.load %arg3[%c0_2, %c0_3] : memref<1024x128xbf16, #tpu.memory_space<vmem>>, vector<1024x128xbf16>
    %cst_4 = arith.constant dense<0.000000e+00> : vector<8x128xf32>
    %4 = tpu.matmul %2, %3, %cst_4 {dimension_numbers = #tpu.dot_dimension_numbers<[1], [0], [0], [1], [0, 0, 1, 1], [], []>} : vector<8x1024xbf16>, vector<1024x128xbf16>, vector<8x128xf32> -> vector<8x128xf32>
    %c0_5 = arith.constant 0 : index
    %c0_6 = arith.constant 0 : index
    %5 = vector.load %arg4[%c0_5, %c0_6] : memref<1x128xf32, #tpu.memory_space<vmem>>, vector<1x128xf32>
    %6 = vector.broadcast %5 : vector<1x128xf32> to vector<8x128xf32>
    %7 = arith.addf %4, %6 : vector<8x128xf32>
    %cst_7 = arith.constant 0.000000e+00 : f32
    %8 = vector.broadcast %cst_7 : f32 to vector<8x128xf32>
    %9 = arith.maximumf %7, %8 : vector<8x128xf32>
    %10 = arith.truncf %9 : vector<8x128xf32> to vector<8x128xbf16>
    %c0_8 = arith.constant 0 : index
    %c0_9 = arith.constant 0 : index
    %11 = vector.load %arg5[%c0_8, %c0_9] : memref<128x128xbf16, #tpu.memory_space<vmem>>, vector<128x128xbf16>
    %cst_10 = arith.constant dense<0.000000e+00> : vector<8x128xf32>
    %12 = tpu.matmul %10, %11, %cst_10 {dimension_numbers = #tpu.dot_dimension_numbers<[1], [0], [0], [1], [0, 0, 1, 1], [], []>} : vector<8x128xbf16>, vector<128x128xbf16>, vector<8x128xf32> -> vector<8x128xf32>
    %c0_11 = arith.constant 0 : index
    %c0_12 = arith.constant 0 : index
    %13 = vector.load %arg6[%c0_11, %c0_12] : memref<1x128xf32, #tpu.memory_space<vmem>>, vector<1x128xf32>
    %14 = vector.broadcast %13 : vector<1x128xf32> to vector<8x128xf32>
    %15 = arith.addf %12, %14 : vector<8x128xf32>
    %c0_13 = arith.constant 0 : index
    %c0_14 = arith.constant 0 : index
    %16 = vector.load %arg7[%c0_13, %c0_14] : memref<8x128xf32, #tpu.memory_space<vmem>>, vector<8x128xf32>
    tpu.vector_store %arg7[%c0_13, %c0_14], %15 {strides = array<i32>} : memref<8x128xf32, #tpu.memory_space<vmem>>, vector<8x128xf32>,
    %17 = tpu.iota {dimensions = array<i32: 1>} : vector<8x128xi32>
    %18 = tpu.iota {dimensions = array<i32: 0>} : vector<8x128xi32>
    %c2_i32 = arith.constant 2 : i32
    %19 = vector.broadcast %c2_i32 : i32 to vector<8x128xi32>
    %20 = arith.cmpi slt, %18, %19 : vector<8x128xi32>
    %cst_15 = arith.constant 1.000000e+00 : f32
    %cst_16 = arith.constant 0.000000e+00 : f32
    %21 = vector.broadcast %cst_15 : f32 to vector<8x128xf32>
    %22 = vector.broadcast %cst_16 : f32 to vector<8x128xf32>
    %23 = arith.select %20, %21, %22 : vector<8x128xi1>, vector<8x128xf32>
    %cst_17 = arith.constant dense<0xFF800000> : vector<8xf32>
    %24 = vector.multi_reduction <maximumf>, %23, %cst_17 [1] : vector<8x128xf32> to vector<8xf32>
    %25 = vector.shape_cast %24 : vector<8xf32> to vector<8x1xf32>
    %c10_i32 = arith.constant 10 : i32
    %26 = vector.broadcast %c10_i32 : i32 to vector<8x128xi32>
    %27 = arith.cmpi slt, %17, %26 : vector<8x128xi32>
    %cst_18 = arith.constant -1.000000e+30 : f32
    %28 = vector.broadcast %cst_18 : f32 to vector<8x128xf32>
    %29 = arith.select %27, %15, %28 : vector<8x128xi1>, vector<8x128xf32>
    %cst_19 = arith.constant dense<0xFF800000> : vector<8xf32>
    %30 = vector.multi_reduction <maximumf>, %29, %cst_19 [1] : vector<8x128xf32> to vector<8xf32>
    %31 = vector.shape_cast %30 : vector<8xf32> to vector<8x1xf32>
    %32 = vector.broadcast %31 : vector<8x1xf32> to vector<8x128xf32>
    %33 = arith.subf %29, %32 : vector<8x128xf32>
    %34 = math.exp %33 : vector<8x128xf32>
    %cst_20 = arith.constant dense<0.000000e+00> : vector<8xf32>
    %35 = vector.multi_reduction <add>, %34, %cst_20 [1] : vector<8x128xf32> to vector<8xf32>
    %36 = vector.shape_cast %35 : vector<8xf32> to vector<8x1xf32>
    %37 = math.log %36 : vector<8x1xf32>
    %38 = arith.addf %31, %37 : vector<8x1xf32>
    %c-1_i32 = arith.constant -1 : i32
    %39 = vector.broadcast %c-1_i32 : i32 to vector<8x128xi32>
    %c-1_i32_21 = arith.constant -1 : i32
    %40 = vector.broadcast %c-1_i32_21 : i32 to vector<8x128xi32>
    %c0_i32 = arith.constant 0 : i32
    %41 = vector.broadcast %c0_i32 : i32 to vector<8x128xi32>
    %42 = arith.cmpi eq, %18, %41 : vector<8x128xi32>
    %c0_22 = arith.constant 0 : index
    %c0_23 = arith.constant 0 : index
    %43 = memref.load %arg1[%c0_22, %c0_23] : memref<2x2xi32, #tpu.memory_space<smem>>
    %44 = vector.broadcast %43 : i32 to vector<8x128xi32>
    %45 = arith.select %42, %44, %39 : vector<8x128xi1>, vector<8x128xi32>
    %c0_i32_24 = arith.constant 0 : i32
    %46 = vector.broadcast %c0_i32_24 : i32 to vector<8x128xi32>
    %47 = arith.cmpi eq, %18, %46 : vector<8x128xi32>
    %c0_25 = arith.constant 0 : index
    %c1 = arith.constant 1 : index
    %48 = memref.load %arg1[%c0_25, %c1] : memref<2x2xi32, #tpu.memory_space<smem>>
    %49 = vector.broadcast %48 : i32 to vector<8x128xi32>
    %50 = arith.select %47, %49, %40 : vector<8x128xi1>, vector<8x128xi32>
    %c1_i32 = arith.constant 1 : i32
    %51 = vector.broadcast %c1_i32 : i32 to vector<8x128xi32>
    %52 = arith.cmpi eq, %18, %51 : vector<8x128xi32>
    %c1_26 = arith.constant 1 : index
    %c0_27 = arith.constant 0 : index
    %53 = memref.load %arg1[%c1_26, %c0_27] : memref<2x2xi32, #tpu.memory_space<smem>>
    %54 = vector.broadcast %53 : i32 to vector<8x128xi32>
    %55 = arith.select %52, %54, %45 : vector<8x128xi1>, vector<8x128xi32>
    %c1_i32_28 = arith.constant 1 : i32
    %56 = vector.broadcast %c1_i32_28 : i32 to vector<8x128xi32>
    %57 = arith.cmpi eq, %18, %56 : vector<8x128xi32>
    %c1_29 = arith.constant 1 : index
    %c1_30 = arith.constant 1 : index
    %58 = memref.load %arg1[%c1_29, %c1_30] : memref<2x2xi32, #tpu.memory_space<smem>>
    %59 = vector.broadcast %58 : i32 to vector<8x128xi32>
    %60 = arith.select %57, %59, %50 : vector<8x128xi1>, vector<8x128xi32>
    %61 = arith.cmpi eq, %17, %55 : vector<8x128xi32>
    %cst_31 = arith.constant 0.000000e+00 : f32
    %62 = vector.broadcast %cst_31 : f32 to vector<8x128xf32>
    %63 = arith.select %61, %15, %62 : vector<8x128xi1>, vector<8x128xf32>
    %cst_32 = arith.constant dense<0.000000e+00> : vector<8xf32>
    %64 = vector.multi_reduction <add>, %63, %cst_32 [1] : vector<8x128xf32> to vector<8xf32>
    %65 = vector.shape_cast %64 : vector<8xf32> to vector<8x1xf32>
    %66 = arith.cmpi eq, %17, %60 : vector<8x128xi32>
    %cst_33 = arith.constant 0.000000e+00 : f32
    %67 = vector.broadcast %cst_33 : f32 to vector<8x128xf32>
    %68 = arith.select %66, %15, %67 : vector<8x128xi1>, vector<8x128xf32>
    %cst_34 = arith.constant dense<0.000000e+00> : vector<8xf32>
    %69 = vector.multi_reduction <add>, %68, %cst_34 [1] : vector<8x128xf32> to vector<8xf32>
    %70 = vector.shape_cast %69 : vector<8xf32> to vector<8x1xf32>
    %71 = arith.subf %38, %65 : vector<8x1xf32>
    %72 = arith.mulf %71, %25 : vector<8x1xf32>
    %73 = arith.subf %38, %70 : vector<8x1xf32>
    %74 = arith.mulf %73, %25 : vector<8x1xf32>
    %75 = vector.broadcast %0 : f32 to vector<8x1xf32>
    %76 = arith.mulf %75, %72 : vector<8x1xf32>
    %77 = vector.broadcast %1 : f32 to vector<8x1xf32>
    %78 = arith.mulf %77, %74 : vector<8x1xf32>
    %79 = arith.addf %76, %78 : vector<8x1xf32>
    %cst_35 = arith.constant dense<0.000000e+00> : vector<1xf32>
    %80 = vector.multi_reduction <add>, %79, %cst_35 [0] : vector<8x1xf32> to vector<1xf32>
    %81 = vector.shape_cast %80 : vector<1xf32> to vector<1x1xf32>
    %cst_36 = arith.constant 5.000000e-01 : f32
    %82 = vector.broadcast %cst_36 : f32 to vector<1x1xf32>
    %83 = arith.mulf %81, %82 : vector<1x1xf32>
    %cst_37 = arith.constant dense<0.000000e+00> : vector<1xf32>
    %84 = vector.multi_reduction <add>, %72, %cst_37 [0] : vector<8x1xf32> to vector<1xf32>
    %85 = vector.shape_cast %84 : vector<1xf32> to vector<1x1xf32>
    %cst_38 = arith.constant 5.000000e-01 : f32
    %86 = vector.broadcast %cst_38 : f32 to vector<1x1xf32>
    %87 = arith.mulf %85, %86 : vector<1x1xf32>
    %cst_39 = arith.constant dense<0.000000e+00> : vector<1xf32>
    %88 = vector.multi_reduction <add>, %74, %cst_39 [0] : vector<8x1xf32> to vector<1xf32>
    %89 = vector.shape_cast %88 : vector<1xf32> to vector<1x1xf32>
    %cst_40 = arith.constant 5.000000e-01 : f32
    %90 = vector.broadcast %cst_40 : f32 to vector<1x1xf32>
    %91 = arith.mulf %89, %90 : vector<1x1xf32>
    %92 = tpu.iota {dimensions = array<i32: 1>} : vector<1x128xi32>
    %c0_i32_41 = arith.constant 0 : i32
    %93 = vector.broadcast %c0_i32_41 : i32 to vector<1x128xi32>
    %94 = arith.cmpi eq, %92, %93 : vector<1x128xi32>
    %cst_42 = arith.constant 0.000000e+00 : f32
    %95 = vector.shape_cast %83 : vector<1x1xf32> to vector<1x1xf32>
    %96 = vector.broadcast %95 : vector<1x1xf32> to vector<1x128xf32>
    %97 = vector.broadcast %cst_42 : f32 to vector<1x128xf32>
    %98 = arith.select %94, %96, %97 : vector<1x128xi1>, vector<1x128xf32>
    %c1_i32_43 = arith.constant 1 : i32
    %99 = vector.broadcast %c1_i32_43 : i32 to vector<1x128xi32>
    %100 = arith.cmpi eq, %92, %99 : vector<1x128xi32>
    %101 = vector.shape_cast %87 : vector<1x1xf32> to vector<1x1xf32>
    %102 = vector.broadcast %101 : vector<1x1xf32> to vector<1x128xf32>
    %103 = arith.select %100, %102, %98 : vector<1x128xi1>, vector<1x128xf32>
    %c2_i32_44 = arith.constant 2 : i32
    %104 = vector.broadcast %c2_i32_44 : i32 to vector<1x128xi32>
    %105 = arith.cmpi eq, %92, %104 : vector<1x128xi32>
    %106 = vector.shape_cast %91 : vector<1x1xf32> to vector<1x1xf32>
    %107 = vector.broadcast %106 : vector<1x1xf32> to vector<1x128xf32>
    %108 = arith.select %105, %107, %103 : vector<1x128xi1>, vector<1x128xf32>
    %c0_45 = arith.constant 0 : index
    %c0_46 = arith.constant 0 : index
    %109 = vector.load %arg8[%c0_45, %c0_46] : memref<1x128xf32, #tpu.memory_space<vmem>>, vector<1x128xf32>
    tpu.vector_store %arg8[%c0_45, %c0_46], %108 {strides = array<i32>} : memref<1x128xf32, #tpu.memory_space<vmem>>, vector<1x128xf32>,
    return
  }
}

</mosaic_0001>

<bundles_post_ra>
// kernel: fused.1
= control target key start
LH: loop header
LB: loop body
LE: loop exit
PB: predicated region body
PF: predicated region fallthrough
CT: control target
= control target key end

     0   :  { %15 = vsyncpa [#allocation5], 0  ;;  %s1439_s0 = inlined_call_operand.<no memory space> [shape: f32[1], index: 0, kind: input, shape index: {}]   ;;  %s1440_s1 = inlined_call_operand.vmem [shape: s32[2,2], index: 1, kind: input, shape index: {}]   ;;  %s1441_s2 = inlined_call_operand.vmem [shape: bf16[8,1024], index: 2, kind: input, shape index: {}]   ;;  %s1442_s3 = inlined_call_operand.hbm [shape: bf16[1024,128], index: 3, kind: input, shape index: {}]   ;;  %s1443_s4 = inlined_call_operand.vmem [shape: f32[1,128], index: 4, kind: input, shape index: {}, may-alias: {4,6}]   ;;  %s1444_s5 = inlined_call_operand.vmem [shape: bf16[128,128], index: 5, kind: input, shape index: {}]   ;;  %s1445_s6 = inlined_call_operand.vmem [shape: f32[1,128], index: 6, kind: input, shape index: {}, may-alias: {4,6}]   ;;  %s1446_s7 = inlined_call_operand.vmem [shape: f32[8,128], index: 7, kind: output, shape index: {0}]   ;;  %s1447_s8 = inlined_call_operand.vmem [shape: f32[1,128], index: 8, kind: output, shape index: {1}]  }
   0x1   :  { %s25_s29 = sshll.u32 %s1440_s1, 4  ;;  %s26_s29 = int_to_ptr.vmem [resolvable:$true] %s25_s29 }
   0x2   :  { %16 = vsyncpa [#allocation4], 0  ;;  %s1263_s30 = scalar_lea.vmem %s26_s29, 32  ;;  %p1268_p1 = scmp.lt.s32.totalorder %s26_s29, %s26_s29 }
   0x3   :  { %p1264_p0 = scmp.ne.s32.totalorder %s26_s29, %s1263_s30  ;;  %p1269_p2 = scmp.lt.s32.totalorder %s1263_s30, %s1263_s30 }
   0x5   :  { %p1270_p3 = por %p1269_p2, %p1268_p1 }
   0x7   :  { %p1271_p4 = pnand %p1270_p3, %p1264_p0 }
   0x9   :  { %1274 = shalt.err (!%p1271_p4)
}
   0xa   :  { %s1301_s9 = smov [#allocation3]   ;;  %s1302_s10 = smov [#allocation6]  }
   0xb   :  { %28 = dma.vmem_to_smem %s26_s29, 32, %s1301_s9, [#allocation5]  }
   0xc   :  { %s36_s11 = sshll.u32 %s1302_s10, 4  ;;  %s1275_s14 = scalar_lea.hbm %s1442_s3, 8192  ;;  %s37_s11 = int_to_ptr.vmem [resolvable:$true] %s36_s11 }
   0xd   :  { %p1276_p5 = scmp.ne.s32.totalorder %s1442_s3, %s1275_s14  ;;  %p1279_p6 = scmp.lt.u32.totalorder %s1275_s14, %s1442_s3 }
   0xf   :  { %p1281_p7 = pnand %p1279_p6, %p1276_p5 }
  0x11   :  { %1284 = shalt.err (!%p1281_p7)
}
  0x12   :  { %s1285_s18 = scalar_lea.vmem %s37_s11, 8192  ;;  %p1290_p9 = scmp.lt.s32.totalorder %s37_s11, %s37_s11 }
  0x13   :  { %p1286_p8 = scmp.ne.s32.totalorder %s37_s11, %s1285_s18  ;;  %p1291_p10 = scmp.lt.s32.totalorder %s1285_s18, %s1285_s18 }
  0x15   :  { %p1292_p11 = por %p1291_p10, %p1290_p9 }
  0x17   :  { %p1293_p12 = pnand %p1292_p11, %p1286_p8 }
  0x19   :  { %1296 = shalt.err (!%p1293_p12)
}
  0x1a   :  { %s1303_s19 = smov 64   ;;  %s1304_s20 = smov 4  }
  0x1b   :  { %42 = dma.hbm_to_vmem [thread:$0]  %s1442_s3, 8192, %s37_s11, [#allocation4], %s1303_s19, %s1303_s19, %s1304_s20  }
  0x1c   :  { %1297 = dma.done.wait [#allocation5], 32  }
  0x1d   :  { %1298 = vsyncadd [#allocation5], 4294967264 }
  0x1e   :  { %1299 = dma.done.wait [#allocation4], 8192  }
  0x1f   :  { %1300 = vsyncadd [#allocation4], 4294959104 }
  0x20   :  { %55 = sfence }
  0x21   :  { %v1179_v0 = vld [vmem:[#allocation6 + $0x40] sm:$0xff]   ;;  %v1183_v4 = vld [vmem:[#allocation6 + $0x48] sm:$0xff]   ;;  %v1187_v8 = vld [vmem:[#allocation6 + $0x50] sm:$0xff]   ;;  %vm1306_vm0 = vmmov 0   ;;  %s1053_s23 = sld [smem:[#allocation3 + $0x1]]  ;;  %s58_s29 = ssub.f32 1.0, %s1439_s0 }
  0x22   :  { %v1180_v1 = vld [vmem:[#allocation6 + $0xc0] sm:$0xff]   ;;  %1056 = vmatprep.subr.bf16.mxu0 %v1179_v0  ;;  %v1184_v5 = vld [vmem:[#allocation6 + $0xc8] sm:$0xff]   ;;  %v1188_v9 = vld [vmem:[#allocation6 + $0xd0] sm:$0xff]   ;;  %s1055_s24 = sld [smem:[#allocation3 + $0x81]] }
  0x23   :  { %v1181_v2 = vld [vmem:[#allocation6] sm:$0xff]   ;;  %1078 = vmatprep.subr.bf16.mxu1 %v1180_v1  ;;  %v1185_v6 = vld [vmem:[#allocation6 + $0x8] sm:$0xff]   ;;  %v1189_v10 = vld [vmem:[#allocation6 + $0x10] sm:$0xff]  }
  0x24   :  { %v1182_v3 = vld [vmem:[#allocation6 + $0x80] sm:$0xff]   ;;  %1057 = vmatpush3.bf16.msra.mxu0 %v1181_v2  ;;  %v1186_v7 = vld [vmem:[#allocation6 + $0x88] sm:$0xff]   ;;  %v1190_v11 = vld [vmem:[#allocation6 + $0x90] sm:$0xff]  }
  0x25   :  { %1079 = vmatpush3.bf16.msra.mxu1 %v1182_v3  ;;  %1058 = vmatprep.subr.bf16.mxu0 %v1183_v4  ;;  %v1191_v12 = vld [vmem:[#allocation6 + $0x58] sm:$0xff]   ;;  %v1195_v16 = vld [vmem:[#allocation6 + $0x60] sm:$0xff]   ;;  %v1199_v20 = vld [vmem:[#allocation6 + $0x68] sm:$0xff]  }
  0x26   :  { %1080 = vmatprep.subr.bf16.mxu1 %v1184_v5  ;;  %v1192_v13 = vld [vmem:[#allocation6 + $0xd8] sm:$0xff]   ;;  %v1196_v17 = vld [vmem:[#allocation6 + $0xe0] sm:$0xff]   ;;  %v1200_v21 = vld [vmem:[#allocation6 + $0xe8] sm:$0xff]  }
  0x27   :  { %v1193_v14 = vld [vmem:[#allocation6 + $0x18] sm:$0xff]   ;;  %v1197_v18 = vld [vmem:[#allocation6 + $0x20] sm:$0xff]   ;;  %v1201_v22 = vld [vmem:[#allocation6 + $0x28] sm:$0xff]  }
  0x28   :  { %1059 = vmatpush3.bf16.msra.mxu0 %v1185_v6  ;;  %v1194_v15 = vld [vmem:[#allocation6 + $0x98] sm:$0xff]   ;;  %v1198_v19 = vld [vmem:[#allocation6 + $0xa0] sm:$0xff]   ;;  %v1202_v23 = vld [vmem:[#allocation6 + $0xa8] sm:$0xff]  }
  0x29   :  { %1081 = vmatpush3.bf16.msra.mxu1 %v1186_v7  ;;  %1060 = vmatprep.subr.bf16.mxu0 %v1187_v8  ;;  %v1203_v24 = vld [vmem:[#allocation6 + $0x70] sm:$0xff]   ;;  %v1207_v28 = vld [vmem:[#allocation6 + $0x78] sm:$0xff]   ;;  %v59_v32 = vld [vmem:[%s1441_s2] sm:$0xff] }
  0x2a   :  { %1082 = vmatprep.subr.bf16.mxu1 %v1188_v9  ;;  %v1204_v25 = vld [vmem:[#allocation6 + $0xf0] sm:$0xff]   ;;  %v1208_v29 = vld [vmem:[#allocation6 + $0xf8] sm:$0xff]   ;;  %v60_v33 = vld [vmem:[%s1441_s2 + $0x8] sm:$0xff]  ;;  %v972_v34 = vcombine.low %v59_v32, %v59_v32  ;;  %v973_v35 = vcombine.high %v59_v32, %v59_v32 }
  0x2b   :  { %v1205_v26 = vld [vmem:[#allocation6 + $0x30] sm:$0xff]   ;;  %v1209_v30 = vld [vmem:[#allocation6 + $0x38] sm:$0xff]   ;;  %v974_v36 = vcombine.low %v60_v33, %v60_v33  ;;  %v975_v37 = vcombine.high %v60_v33, %v60_v33  ;;  %v1215_v38 = vld [vmem:[#allocation6 + $0x140] sm:$0xff]  }
  0x2c   :  { %1061 = vmatpush3.bf16.msra.mxu0 %v1189_v10  ;;  %v1206_v27 = vld [vmem:[#allocation6 + $0xb0] sm:$0xff]   ;;  %v1210_v31 = vld [vmem:[#allocation6 + $0xb8] sm:$0xff]   ;;  %v1216_v39 = vld [vmem:[#allocation6 + $0x1c0] sm:$0xff]   ;;  %642 = vmatprep.mubr.bf16.mxu0 %v973_v35 }
  0x2d   :  { %1083 = vmatpush3.bf16.msra.mxu1 %v1190_v11  ;;  %1062 = vmatprep.subr.bf16.mxu0 %v1191_v12  ;;  %v1217_v40 = vld [vmem:[#allocation6 + $0x100] sm:$0xff]   ;;  %v1219_v42 = vld [vmem:[#allocation6 + $0x148] sm:$0xff]   ;;  %v1223_v46 = vld [vmem:[#allocation6 + $0x150] sm:$0xff]  }
  0x2e   :  { %1084 = vmatprep.subr.bf16.mxu1 %v1192_v13  ;;  %682 = vmatprep.mubr.bf16.mxu1 %v975_v37  ;;  %v1218_v41 = vld [vmem:[#allocation6 + $0x180] sm:$0xff]   ;;  %v1220_v43 = vld [vmem:[#allocation6 + $0x1c8] sm:$0xff]   ;;  %v1224_v47 = vld [vmem:[#allocation6 + $0x1d0] sm:$0xff]   ;;  %v1305_v13 = vmov 0.0  }
  0x2f   :  { %v1221_v44 = vld [vmem:[#allocation6 + $0x108] sm:$0xff]   ;;  %v1225_v48 = vld [vmem:[#allocation6 + $0x110] sm:$0xff]   ;;  %v1227_v50 = vld [vmem:[#allocation6 + $0x158] sm:$0xff]  }
  0x30   :  { %1063 = vmatpush3.bf16.msra.mxu0 %v1193_v14  ;;  %v1222_v45 = vld [vmem:[#allocation6 + $0x188] sm:$0xff]   ;;  %v1226_v49 = vld [vmem:[#allocation6 + $0x190] sm:$0xff]   ;;  %v1228_v51 = vld [vmem:[#allocation6 + $0x1d8] sm:$0xff]  }
  0x31   :  { %1085 = vmatpush3.bf16.msra.mxu1 %v1194_v15  ;;  %1064 = vmatprep.subr.bf16.mxu0 %v1195_v16  ;;  %v1229_v52 = vld [vmem:[#allocation6 + $0x118] sm:$0xff]   ;;  %v1231_v54 = vld [vmem:[#allocation6 + $0x160] sm:$0xff]   ;;  %v1235_v58 = vld [vmem:[#allocation6 + $0x168] sm:$0xff]  }
  0x32   :  { %1086 = vmatprep.subr.bf16.mxu1 %v1196_v17  ;;  %v1230_v53 = vld [vmem:[#allocation6 + $0x198] sm:$0xff]   ;;  %v1232_v55 = vld [vmem:[#allocation6 + $0x1e0] sm:$0xff]   ;;  %v1236_v59 = vld [vmem:[#allocation6 + $0x1e8] sm:$0xff]  }
  0x33   :  { %v1233_v56 = vld [vmem:[#allocation6 + $0x120] sm:$0xff]   ;;  %v1237_v60 = vld [vmem:[#allocation6 + $0x128] sm:$0xff]   ;;  %v1239_v62 = vld [vmem:[#allocation6 + $0x170] sm:$0xff]  }
  0x34   :  { %1065 = vmatpush3.bf16.msra.mxu0 %v1197_v18  ;;  %v1234_v57 = vld [vmem:[#allocation6 + $0x1a0] sm:$0xff]   ;;  %v1238_v61 = vld [vmem:[#allocation6 + $0x1a8] sm:$0xff]   ;;  %v1240_v63 = vld [vmem:[#allocation6 + $0x1f0] sm:$0xff]  }
  0x35   :  { %1087 = vmatpush3.bf16.msra.mxu1 %v1198_v19  ;;  %1066 = vmatprep.subr.bf16.mxu0 %v1199_v20  ;;  %v1241_v0 = vld [vmem:[#allocation6 + $0x130] sm:$0xff]   ;;  %v1243_v2 = vld [vmem:[#allocation6 + $0x178] sm:$0xff]   ;;  %v1251_v12 = vld [vmem:[%s1444_s5] sm:$0xff]  }
  0x36   :  { %1088 = vmatprep.subr.bf16.mxu1 %v1200_v21  ;;  %v1242_v1 = vld [vmem:[#allocation6 + $0x1b0] sm:$0xff]   ;;  %v1244_v3 = vld [vmem:[#allocation6 + $0x1f8] sm:$0xff]   ;;  %v1252_v14 = vld [vmem:[%s1444_s5 + $0x8] sm:$0xff]  }
  0x37   :  { %v1245_v4 = vld [vmem:[#allocation6 + $0x138] sm:$0xff]   ;;  %v61_v6 = vld [vmem:[%s1441_s2 + $0x10] sm:$0xff]  ;;  %v1255_v17 = vld [vmem:[%s1444_s5 + $0x20] sm:$0xff]  }
  0x38   :  { %1067 = vmatpush3.bf16.msra.mxu0 %v1201_v22  ;;  %v1246_v5 = vld [vmem:[#allocation6 + $0x1b8] sm:$0xff]   ;;  %v976_v7 = vcombine.low %v61_v6, %v61_v6  ;;  %v977_v8 = vcombine.high %v61_v6, %v61_v6  ;;  %v1253_v15 = vld [vmem:[%s1444_s5 + $0x10] sm:$0xff]   ;;  %v1256_v18 = vld [vmem:[%s1444_s5 + $0x28] sm:$0xff]  }
  0x39   :  { %1089 = vmatpush3.bf16.msra.mxu1 %v1202_v23  ;;  %1068 = vmatprep.subr.bf16.mxu0 %v1203_v24  ;;  %v62_v9 = vld [vmem:[%s1441_s2 + $0x18] sm:$0xff]  ;;  %v1257_v19 = vld [vmem:[%s1444_s5 + $0x30] sm:$0xff]   ;;  %v971_v23 = vld [vmem:[%s1443_s4] ss:$0 sm:$0xff]  ;;  %s903_s4 = sld [smem:[#allocation3]] }
  0x3a   :  { %1090 = vmatprep.subr.bf16.mxu1 %v1204_v25  ;;  %v978_v10 = vcombine.low %v62_v9, %v62_v9  ;;  %v979_v11 = vcombine.high %v62_v9, %v62_v9  ;;  %v1254_v16 = vld [vmem:[%s1444_s5 + $0x18] sm:$0xff]  }
  0x3b   :  { %v1258_v20 = vld [vmem:[%s1444_s5 + $0x38] sm:$0xff]   ;;  %s1054_s5 = sld [smem:[#allocation3 + $0x80]] }
  0x3c   :  { %1069 = vmatpush3.bf16.msra.mxu0 %v1205_v26 }
  0x3d   :  { %1091 = vmatpush3.bf16.msra.mxu1 %v1206_v27  ;;  %1070 = vmatprep.subr.bf16.mxu0 %v1207_v28 }
  0x3e   :  { %1092 = vmatprep.subr.bf16.mxu1 %v1208_v29 }
  0x40   :  { %1071 = vmatpush3.bf16.msra.mxu0 %v1209_v30 }
  0x41   :  { %1093 = vmatpush3.bf16.msra.mxu1 %v1210_v31  ;;  %1100 = vmatprep.subr.bf16.mxu0 %v1215_v38 }
  0x42   :  { %1122 = vmatprep.subr.bf16.mxu1 %v1216_v39 }
  0x43   :  { %643 = vmatmul.mubr.bf16.vlgmr.msra.gmra.mrb[0].mxu0 %v972_v34 }
  0x44   :  { %683 = vmatmul.mubr.bf16.vlgmr.msra.gmra.mrb[0].mxu1 %v974_v36  ;;  %1101 = vmatpush3.bf16.msra.mxu0 %v1217_v40 }
  0x45   :  { %1123 = vmatpush3.bf16.msra.mxu1 %v1218_v41  ;;  %1102 = vmatprep.subr.bf16.mxu0 %v1219_v42 }
  0x46   :  { %1124 = vmatprep.subr.bf16.mxu1 %v1220_v43  ;;  %722 = vmatprep.mubr.bf16.mxu0 %v977_v8 }
  0x47   :  { %762 = vmatprep.mubr.bf16.mxu1 %v979_v11 }
  0x48   :  { %1103 = vmatpush3.bf16.msra.mxu0 %v1221_v44 }
  0x49   :  { %1125 = vmatpush3.bf16.msra.mxu1 %v1222_v45  ;;  %1104 = vmatprep.subr.bf16.mxu0 %v1223_v46 }
  0x4a   :  { %1126 = vmatprep.subr.bf16.mxu1 %v1224_v47 }
  0x4c   :  { %1105 = vmatpush3.bf16.msra.mxu0 %v1225_v48  ;;  %v884_v48 = vlaneseq }
  0x4d   :  { %1127 = vmatpush3.bf16.msra.mxu1 %v1226_v49  ;;  %1106 = vmatprep.subr.bf16.mxu0 %v1227_v50  ;;  %v904_v50 = vstv %s903_s4 }
  0x4e   :  { %1128 = vmatprep.subr.bf16.mxu1 %v1228_v51  ;;  %v887_v49 = vshrl.u32 %v884_v48, 7 }
  0x50   :  { %1107 = vmatpush3.bf16.msra.mxu0 %v1229_v52  ;;  %vm902_vm1 = vcmp.eq.s32.totalorder %v887_v49, 0  ;;  %vm909_vm2 = vcmp.eq.s32.totalorder %v887_v49, 1  ;;  %v911_v52 = vstv %s1054_s5  ;;  %vm888_vm6 = vcmp.lt.s32.totalorder %v887_v49, 2 }
  0x51   :  { %1129 = vmatpush3.bf16.msra.mxu1 %v1230_v53  ;;  %1108 = vmatprep.subr.bf16.mxu0 %v1231_v54  ;;  %v905_v51 = vsel %vm902_vm1, %v904_v50, 4294967295  ;;  %v907_v53 = vstv %s1053_s23  ;;  %v1415_v54 = vand.u32 127, %v884_v48 }
  0x52   :  { %1130 = vmatprep.subr.bf16.mxu1 %v1232_v55  ;;  %v912_v55 = vsel %vm909_vm2, %v911_v52, %v905_v51 }
  0x53   :  { %vm916_vm3 = vcmp.eq.s32.totalorder %v1415_v54, %v912_v55  ;;  %vm890_vm4 = vcmp.lt.s32.totalorder %v1415_v54, 10  ;;  %vm954_vm7 = vcmp.eq.s32.totalorder %v1415_v54, 0  ;;  %vm956_vm8 = vcmp.eq.s32.totalorder %v1415_v54, 1 }
  0x54   :  { %1109 = vmatpush3.bf16.msra.mxu0 %v1233_v56  ;;  %v1044_v56 = vld [vmem:[%s1445_s6] ss:$0 sm:$0xff]  ;;  %vm958_vm9 = vcmp.eq.s32.totalorder %v1415_v54, 2 }
  0x55   :  { %1131 = vmatpush3.bf16.msra.mxu1 %v1234_v57  ;;  %1110 = vmatprep.subr.bf16.mxu0 %v1235_v58  ;;  %v908_v57 = vsel %vm902_vm1, %v907_v53, 4294967295  ;;  %v914_v58 = vstv %s1055_s24 }
  0x56   :  { %1132 = vmatprep.subr.bf16.mxu1 %v1236_v59 }
  0x58   :  { %1111 = vmatpush3.bf16.msra.mxu0 %v1237_v60 }
  0x59   :  { %1133 = vmatpush3.bf16.msra.mxu1 %v1238_v61  ;;  %1112 = vmatprep.subr.bf16.mxu0 %v1239_v62  ;;  %v915_v62 = vsel %vm909_vm2, %v914_v58, %v908_v57 }
  0x5a   :  { %1134 = vmatprep.subr.bf16.mxu1 %v1240_v63  ;;  %vm920_vm5 = vcmp.eq.s32.totalorder %v1415_v54, %v915_v62 }
  0x5c   :  { %1113 = vmatpush3.bf16.msra.mxu0 %v1241_v0 }
  0x5d   :  { %1135 = vmatpush3.bf16.msra.mxu1 %v1242_v1  ;;  %1114 = vmatprep.subr.bf16.mxu0 %v1243_v2 }
  0x5e   :  { %1136 = vmatprep.subr.bf16.mxu1 %v1244_v3 }
  0x60   :  { %1115 = vmatpush3.bf16.msra.mxu0 %v1245_v4 }
  0x61   :  { %1137 = vmatpush3.bf16.msra.mxu1 %v1246_v5  ;;  %1153 = vmatprep.subr.bf16.mxu0 %v1305_v13 }
  0x63   :  { %723 = vmatmul.mubr.bf16.vlgmr.msra.gmra.mrb[4].mxu0 %v976_v7 }
  0x64   :  { %763 = vmatmul.mubr.bf16.vlgmr.msra.gmra.mrb[4].mxu1 %v978_v10  ;;  %1154 = vmatpush3.bf16.msra.mxu0 %v1251_v12 }
  0x65   :  { %1155 = vmatprep.subr.bf16.mxu0 %v1305_v13  ;;  %1169 = vmatprep.mubr.msk.bf16.mxu0 %vm1306_vm0, %v1305_v13 }
  0x68   :  { %1156 = vmatpush3.bf16.msra.mxu0 %v1252_v14 }
  0x69   :  { %1157 = vmatprep.subr.bf16.mxu0 %v1305_v13 }
  0x6c   :  { %1158 = vmatpush3.bf16.msra.mxu0 %v1253_v15  ;;  %v889_v15 = vsel %vm888_vm6, 1.0, %v1305_v13 }
  0x6d   :  { %1159 = vmatprep.subr.bf16.mxu0 %v1305_v13 }
  0x70   :  { %1160 = vmatpush3.bf16.msra.mxu0 %v1254_v16 }
  0x71   :  { %1161 = vmatprep.subr.bf16.mxu0 %v1305_v13 }
  0x74   :  { %1162 = vmatpush3.bf16.msra.mxu0 %v1255_v17 }
  0x75   :  { %1163 = vmatprep.subr.bf16.mxu0 %v1305_v13 }
  0x78   :  { %1164 = vmatpush3.bf16.msra.mxu0 %v1256_v18  ;;  %v928_v18 = vstv %s1439_s0 }
  0x79   :  { %1165 = vmatprep.subr.bf16.mxu0 %v1305_v13 }
  0x7c   :  { %1166 = vmatpush3.bf16.msra.mxu0 %v1257_v19  ;;  %v930_v19 = vstv %s58_s29 }
  0x7d   :  { %1167 = vmatprep.subr.bf16.mxu0 %v1305_v13 }
  0x80   :  { %1168 = vmatpush3.bf16.msra.mxu0 %v1258_v20 }
 0x116   :  { %v1072_v21 = vpop.f32.mrb[0].mxu0 }
 0x117   :  { %v1094_v22 = vpop.f32.mrb[0].mxu1  ;;  %v1073_v24 = vpop.f32.mrb[1].mxu0 }
 0x118   :  { %v1095_v25 = vpop.f32.mrb[1].mxu1  ;;  %v1074_v26 = vadd.f32 %v1073_v24, %v1072_v21  ;;  %v1075_v28 = vpop.f32.mrb[2].mxu0 }
 0x119   :  { %v1096_v27 = vadd.f32 %v1095_v25, %v1094_v22  ;;  %v1097_v29 = vpop.f32.mrb[2].mxu1  ;;  %v1076_v30 = vpop.f32.mrb[3].mxu0 }
 0x11a   :  { %v1098_v31 = vpop.f32.mrb[3].mxu1  ;;  %v645_v32 = vadd.f32 %v1074_v26, %v971_v23 }
 0x11c   :  { %v685_v33 = vadd.f32 %v1096_v27, %v645_v32 }
 0x136   :  { %v1116_v34 = vpop.f32.mrb[4].mxu0 }
 0x137   :  { %v1138_v35 = vpop.f32.mrb[4].mxu1  ;;  %v1117_v36 = vpop.f32.mrb[5].mxu0 }
 0x138   :  { %v1139_v37 = vpop.f32.mrb[5].mxu1  ;;  %v1118_v38 = vadd.f32 %v1117_v36, %v1116_v34  ;;  %v1119_v40 = vpop.f32.mrb[6].mxu0 }
 0x139   :  { %v1140_v39 = vadd.f32 %v1139_v37, %v1138_v35  ;;  %v1141_v41 = vpop.f32.mrb[6].mxu1  ;;  %v1120_v42 = vpop.f32.mrb[7].mxu0 }
 0x13a   :  { %v1142_v43 = vpop.f32.mrb[7].mxu1  ;;  %v725_v44 = vadd.f32 %v1118_v38, %v685_v33 }
 0x13c   :  { %v765_v45 = vadd.f32 %v1140_v39, %v725_v44 }
 0x13e   :  { %v770_v46 = vmax.f32 %v765_v45, 0.0 }
 0x140   :  { %v771_v47 = vpack.c.bf16 %v770_v46, %v770_v46 }
 0x142   :  { %1170 = vmatmul.mubr.bf16.vlgmr.msra.gmra.mrb[8].mxu0 %v771_v47 }
 0x215   :  { %v877_v59 = vpop.f32.mrb[8].mxu0 }
 0x216   :  { %v878_v60 = vadd.f32 %v1044_v56, %v877_v59  ;;  %v1171_v61 = vpop.f32.mrb[9].mxu0 }
 0x217   :  { %v880_v63 = vpop.f32.mrb[10].mxu0 }
 0x218   :  { %883 = vst [vmem:[%s1446_s7] sm:$0xff] %v878_v60  ;;  %v1172_v0 = vpop.f32.mrb[11].mxu0  ;;  %v917_v1 = vsel %vm916_vm3, %v878_v60, 0.0  ;;  %v891_v2 = vsel %vm890_vm4, %v878_v60, -1e+30  ;;  %v921_v3 = vsel %vm920_vm5, %v878_v60, 0.0 }
 0x219   :  { %918 = vadd.xlane.f32.xlu1 %v917_v1  ;;  %892 = vmax.xlane.f32.xlu0 %v891_v2 }
 0x21d   :  { %922 = vadd.xlane.f32.xlu1 %v921_v3 }
 0x2a6   :  { %v893_v4 = vpop.xlane.xlu0 %892  ;;  %v919_v9 = vpop.xlane.xlu1 %918 }
 0x2a7   :  { %v894_v5 = vsub.f32 %v891_v2, %v893_v4 }
 0x2a9   :  { %v895_v6 = vmul.f32 1.442695, %v894_v5 }
 0x2aa   :  { %v923_v14 = vpop.xlane.xlu1 %922 }
 0x2ab   :  { %1259 = vpow2.f32 %v895_v6 }
 0x2b5   :  { %v1260_v7 = vpop.eup %1259 }
 0x2b6   :  { %897 = vadd.xlane.f32.xlu0 %v1260_v7 }
 0x343   :  { %v898_v8 = vpop.xlane.xlu0 %897 }
 0x344   :  { %1261 = vlog2.f32 %v898_v8 }
 0x34e   :  { %v1262_v10 = vpop.eup %1261 }
 0x34f   :  { %v900_v11 = vmul.f32 0.6931472, %v1262_v10 }
 0x351   :  { %v901_v12 = vadd.f32 %v900_v11, %v893_v4 }
 0x353   :  { %v924_v16 = vsub.f32 %v901_v12, %v919_v9  ;;  %v926_v17 = vsub.f32 %v901_v12, %v923_v14 }
 0x355   :  { %v925_v20 = vmul.f32 %v924_v16, %v889_v15  ;;  %v927_v21 = vmul.f32 %v926_v17, %v889_v15 }
 0x357   :  { %v929_v22 = vmul.f32 %v928_v18, %v925_v20  ;;  %v931_v23 = vmul.f32 %v930_v19, %v927_v21  ;;  %v940_v24 = vrot.slane %v925_v20, 4  ;;  %v947_v25 = vrot.slane %v927_v21, 4 }
 0x359   :  { %v932_v26 = vadd.f32 %v931_v23, %v929_v22  ;;  %v941_v27 = vadd.f32 %v940_v24, %v925_v20  ;;  %v948_v28 = vadd.f32 %v947_v25, %v927_v21 }
 0x35b   :  { %v933_v29 = vrot.slane %v932_v26, 4  ;;  %v942_v30 = vrot.slane %v941_v27, 2  ;;  %v949_v31 = vrot.slane %v948_v28, 2 }
 0x35d   :  { %v934_v13 = vadd.f32 %v933_v29, %v932_v26  ;;  %v943_v32 = vadd.f32 %v942_v30, %v941_v27  ;;  %v950_v33 = vadd.f32 %v949_v31, %v948_v28 }
 0x35f   :  { %v935_v34 = vrot.slane %v934_v13, 2  ;;  %v944_v35 = vrot.slane %v943_v32, 1  ;;  %v951_v37 = vrot.slane %v950_v33, 1 }
 0x361   :  { %v936_v36 = vadd.f32 %v935_v34, %v934_v13  ;;  %v945_v39 = vadd.f32 %v944_v35, %v943_v32  ;;  %v952_v41 = vadd.f32 %v951_v37, %v950_v33 }
 0x363   :  { %v937_v38 = vrot.slane %v936_v36, 1  ;;  %v946_v43 = vmul.f32 0.5, %v945_v39  ;;  %v953_v44 = vmul.f32 0.5, %v952_v41 }
 0x365   :  { %v938_v40 = vadd.f32 %v937_v38, %v936_v36 }
 0x367   :  { %v939_v42 = vmul.f32 0.5, %v938_v40 }
 0x369   :  { %v955_v45 = vsel %vm954_vm7, %v939_v42, 0.0 }
 0x36a   :  { %v957_v46 = vsel %vm956_vm8, %v946_v43, %v955_v45 }
 0x36b   :  { %v959_v47 = vsel %vm958_vm9, %v953_v44, %v957_v46 }
 0x36c   :  { %960 = vst [vmem:[%s1447_s8] sm:$0x1] %v959_v47 }
 0x36d   :  { %969 = vsyncpa [#allocation4], 1 }
 0x36e   :  { %970 = vsyncpa [#allocation5], 1 }

</bundles_post_ra>
